<compile_context>
chip_gen: v5e
topology: v5e:2x2
jax: 0.10.0
libtpu: 0.0.40
codegen_flags: <defaults>
</compile_context>

<pallas_src>
import jax
import jax.numpy as jnp
from jax.experimental import pallas as pl
from jax.experimental.pallas import tpu as pltpu


def _round_up(x: int, m: int) -> int:
    return ((x + m - 1) // m) * m


def pool_bond_kernel(hu_ref, hv_ref, w1ab_ref, b1_ref, w2_ref, b2x2_ref, out_ref):
    """One edge-tile of the split-W1 MLP + symmetric (fwd+rev) sum.

    hu_ref, hv_ref : (TILE_E, Hp)    gathered node features of the two endpoints
    w1ab_ref       : (Hp, 2*D1p)     [W1a | W1b] (first linear split along input axis)
    b1_ref         : (1, D1p)
    w2_ref         : (D1p, D2p)      second linear weight (lane-padded)
    b2x2_ref       : (1, D2p)        2 * b2 (lane-padded)
    out_ref        : (TILE_E, D2p)
    """
    hu = hu_ref[...]
    hv = hv_ref[...]
    w1ab = w1ab_ref[...]
    d1p = w1ab.shape[1] // 2            # static, multiple of 128 -> aligned slices

    # cat([hu, hv], 1) @ W1 == hu @ W1a + hv @ W1b   (reverse edge swaps hu/hv).
    # One matmul per endpoint against the fused [W1a | W1b].
    zu = jnp.dot(hu, w1ab, preferred_element_type=jnp.float32)   # [ua | ub]
    zv = jnp.dot(hv, w1ab, preferred_element_type=jnp.float32)   # [va | vb]

    b1 = b1_ref[...]
    z_fwd = jnp.maximum(zu[:, :d1p] + zv[:, d1p:] + b1, 0.0)     # relu(ua + vb + b1)
    z_rev = jnp.maximum(zv[:, :d1p] + zu[:, d1p:] + b1, 0.0)     # relu(va + ub + b1)

    # Merged second layer: mlp(fwd) + mlp(rev) = (z_fwd + z_rev) @ W2 + 2*b2
    y = jnp.dot((z_fwd + z_rev).astype(w2_ref.dtype), w2_ref[...],
                preferred_element_type=jnp.float32) + b2x2_ref[...]
    out_ref[...] = y.astype(out_ref.dtype)


def pool_bond_features(h, src, dst, w1, b1, w2, b2, *, tile_e=512, use_bf16=False):
    """PoolBondFeatures forward. h:(Np,H), src/dst:(E,), w1:(2H,D1), w2:(D1,D2)."""
    h = h.astype(jnp.float32)
    n_nodes, hidden = h.shape
    e = int(src.shape[0])
    d1 = int(w1.shape[1])
    d2 = int(w2.shape[1])

    # Lane-dense padded dimensions (all padding is with zeros -> exact result).
    hp = _round_up(hidden, 128)
    d1p = _round_up(d1, 128)
    d2p = _round_up(d2, 128)

    compute_dtype = jnp.bfloat16 if use_bf16 else jnp.float32

    # Fused, padded first-layer weight: [W1a | W1b] with W1a = w1[:H], W1b = w1[H:].
    w1_f = w1.astype(jnp.float32)
    w1ab = jnp.zeros((hp, 2 * d1p), jnp.float32)
    w1ab = w1ab.at[:hidden, :d1].set(w1_f[:hidden])
    w1ab = w1ab.at[:hidden, d1p:d1p + d1].set(w1_f[hidden:])
    w1ab = w1ab.astype(compute_dtype)

    b1p = jnp.zeros((1, d1p), jnp.float32).at[:, :d1].set(
        b1.reshape(1, d1).astype(jnp.float32))

    w2p = jnp.zeros((d1p, d2p), jnp.float32).at[:d1, :d2].set(
        w2.astype(jnp.float32)).astype(compute_dtype)
    b2x2 = jnp.zeros((1, d2p), jnp.float32).at[:, :d2].set(
        2.0 * b2.reshape(1, d2).astype(jnp.float32))

    # Tile over edges; pad the ragged tail with node index 0 (valid row) and slice off.
    tile = min(tile_e, _round_up(e, 8))
    e_pad = _round_up(e, tile)
    src_p = jnp.zeros((e_pad,), jnp.int32).at[:e].set(src.astype(jnp.int32))
    dst_p = jnp.zeros((e_pad,), jnp.int32).at[:e].set(dst.astype(jnp.int32))

    # Wrapper-side (XLA) gather of node rows; lane-padded feature dim.
    h_pad = jnp.zeros((n_nodes, hp), jnp.float32).at[:, :hidden].set(h)
    hu = h_pad[src_p].astype(compute_dtype)          # (e_pad, hp)
    hv = h_pad[dst_p].astype(compute_dtype)          # (e_pad, hp)

    grid = (e_pad // tile,)

    in_dt = jnp.dtype(compute_dtype).itemsize

    # VMEM budget from actual buffers: streamed blocks are double-buffered by the
    # BlockSpec pipeline; constant-index weight/bias blocks are small.
    vmem_need = (
        2 * 2 * tile * hp * in_dt            # hu, hv (double-buffered)
        + 2 * tile * d2p * 4                 # output tile (double-buffered)
        + 2 * hp * 2 * d1p * in_dt           # W1ab
        + 2 * d1p * d2p * in_dt              # W2
        + 2 * (d1p + d2p) * 4                # biases
    )
    vmem_limit = min(max(int(vmem_need * 3 // 2) + (2 << 20), 16 << 20), 64 << 20)

    flops = e_pad * (8 * hp * d1p + 2 * d1p * d2p)
    bytes_accessed = (2 * e_pad * hp * in_dt + e_pad * d2p * 4
                      + hp * 2 * d1p * in_dt + d1p * d2p * in_dt
                      + (d1p + d2p) * 4)

    out_full = pl.pallas_call(
        pool_bond_kernel,
        out_shape=jax.ShapeDtypeStruct((e_pad, d2p), jnp.float32),
        grid=grid,
        in_specs=[
            pl.BlockSpec((tile, hp), lambda i: (i, 0)),       # h[src] tile (streamed)
            pl.BlockSpec((tile, hp), lambda i: (i, 0)),       # h[dst] tile (streamed)
            pl.BlockSpec((hp, 2 * d1p), lambda i: (0, 0)),    # W1ab (resident)
            pl.BlockSpec((1, d1p), lambda i: (0, 0)),         # b1   (resident)
            pl.BlockSpec((d1p, d2p), lambda i: (0, 0)),       # W2   (resident)
            pl.BlockSpec((1, d2p), lambda i: (0, 0)),         # 2*b2 (resident)
        ],
        out_specs=pl.BlockSpec((tile, d2p), lambda i: (i, 0)),
        compiler_params=pltpu.CompilerParams(
            dimension_semantics=("parallel",),                # shard edge tiles across TCs
            vmem_limit_bytes=int(vmem_limit),
        ),
        cost_estimate=pl.CostEstimate(
            flops=int(flops), transcendentals=0, bytes_accessed=int(bytes_accessed)),
    )(hu, hv, w1ab, b1p, w2p, b2x2)

    return out_full[:e, :d2]


def reference(h, src, dst, w1, b1, w2, b2):
    """Pure-JAX reference mirroring the PyTorch forward."""
    h_fwd = jnp.concatenate([h[src], h[dst]], axis=1)
    h_rev = jnp.concatenate([h[dst], h[src]], axis=1)

    def mlp(x):
        z = jnp.maximum(x @ w1 + b1, 0.0)
        return z @ w2 + b2

    return mlp(h_fwd) + mlp(h_rev)


if __name__ == "__main__":
    # Small, deterministic synthetic "graph".
    n_nodes, hidden = 12, 32
    n_edges = 16
    d1, d2 = 64, 32

    key = jax.random.PRNGKey(0)
    k_h, k_src, k_dst, k_w1, k_b1, k_w2, k_b2 = jax.random.split(key, 7)

    h = jax.random.normal(k_h, (n_nodes, hidden), dtype=jnp.float32)
    src = jax.random.randint(k_src, (n_edges,), 0, n_nodes, dtype=jnp.int32)
    dst = jax.random.randint(k_dst, (n_edges,), 0, n_nodes, dtype=jnp.int32)

    # Deterministic parameter init (synthetic `layers`: Linear-ReLU-Linear).
    w1 = jax.random.normal(k_w1, (2 * hidden, d1), dtype=jnp.float32) * 0.1
    b1 = jax.random.normal(k_b1, (1, d1), dtype=jnp.float32) * 0.1
    w2 = jax.random.normal(k_w2, (d1, d2), dtype=jnp.float32) * 0.1
    b2 = jax.random.normal(k_b2, (1, d2), dtype=jnp.float32) * 0.1

    out = pool_bond_features(h, src, dst, w1, b1, w2, b2)
    out = jax.block_until_ready(out)

    ref = reference(h, src, dst, w1, b1, w2, b2)
    assert out.shape == (n_edges, d2)
    assert jnp.allclose(out, ref, atol=1e-3, rtol=1e-3), \
        float(jnp.max(jnp.abs(out - ref)))

    print("KERNEL_OK")
</pallas_src>

<mosaic_0001>
module attributes {stable_mosaic.version = 11 : i64} {
  func.func @pool_bond_kernel(%arg0: i32, %arg1: memref<16x128xf32, #tpu.memory_space<vmem>>, %arg2: memref<16x128xf32, #tpu.memory_space<vmem>>, %arg3: memref<128x256xf32, #tpu.memory_space<vmem>>, %arg4: memref<1x128xf32, #tpu.memory_space<vmem>>, %arg5: memref<128x128xf32, #tpu.memory_space<vmem>>, %arg6: memref<1x128xf32, #tpu.memory_space<vmem>>, %arg7: memref<16x128xf32, #tpu.memory_space<vmem>>) attributes {dimension_semantics = [#tpu.dimension_semantics<parallel>], iteration_bounds = array<i64: 1>, scalar_prefetch = 0 : i64, scratch_operands = 0 : i64, tpu.core_type = #tpu.core_type<tc>, window_params = [{transform_indices = @transform_0, window_bounds = array<i64: 16, 128>}, {transform_indices = @transform_1, window_bounds = array<i64: 16, 128>}, {pipeline_mode = #tpu.pipeline_mode<synchronous>, transform_indices = @transform_2, window_bounds = array<i64: 128, 256>}, {pipeline_mode = #tpu.pipeline_mode<synchronous>, transform_indices = @transform_3, window_bounds = array<i64: 1, 128>}, {pipeline_mode = #tpu.pipeline_mode<synchronous>, transform_indices = @transform_4, window_bounds = array<i64: 128, 128>}, {pipeline_mode = #tpu.pipeline_mode<synchronous>, transform_indices = @transform_5, window_bounds = array<i64: 1, 128>}, {transform_indices = @transform_6, window_bounds = array<i64: 16, 128>}]} {
    %c0 = arith.constant 0 : index
    %c0_0 = arith.constant 0 : index
    %0 = vector.load %arg1[%c0, %c0_0] : memref<16x128xf32, #tpu.memory_space<vmem>>, vector<16x128xf32>
    %c0_1 = arith.constant 0 : index
    %c0_2 = arith.constant 0 : index
    %1 = vector.load %arg2[%c0_1, %c0_2] : memref<16x128xf32, #tpu.memory_space<vmem>>, vector<16x128xf32>
    %c0_3 = arith.constant 0 : index
    %c0_4 = arith.constant 0 : index
    %2 = vector.load %arg3[%c0_3, %c0_4] : memref<128x256xf32, #tpu.memory_space<vmem>>, vector<128x256xf32>
    %cst = arith.constant dense<0.000000e+00> : vector<16x256xf32>
    %3 = tpu.matmul %0, %2, %cst {dimension_numbers = #tpu.dot_dimension_numbers<[1], [0], [0], [1], [0, 0, 1, 1], [], []>} : vector<16x128xf32>, vector<128x256xf32>, vector<16x256xf32> -> vector<16x256xf32>
    %cst_5 = arith.constant dense<0.000000e+00> : vector<16x256xf32>
    %4 = tpu.matmul %1, %2, %cst_5 {dimension_numbers = #tpu.dot_dimension_numbers<[1], [0], [0], [1], [0, 0, 1, 1], [], []>} : vector<16x128xf32>, vector<128x256xf32>, vector<16x256xf32> -> vector<16x256xf32>
    %c0_6 = arith.constant 0 : index
    %c0_7 = arith.constant 0 : index
    %5 = vector.load %arg4[%c0_6, %c0_7] : memref<1x128xf32, #tpu.memory_space<vmem>>, vector<1x128xf32>
    %6 = vector.extract_strided_slice %3 {offsets = [0, 0], sizes = [16, 128], strides = [1, 1]} : vector<16x256xf32> to vector<16x128xf32>
    %7 = vector.extract_strided_slice %4 {offsets = [0, 128], sizes = [16, 128], strides = [1, 1]} : vector<16x256xf32> to vector<16x128xf32>
    %8 = arith.addf %6, %7 : vector<16x128xf32>
    %9 = vector.broadcast %5 : vector<1x128xf32> to vector<16x128xf32>
    %10 = arith.addf %8, %9 : vector<16x128xf32>
    %cst_8 = arith.constant 0.000000e+00 : f32
    %11 = vector.broadcast %cst_8 : f32 to vector<16x128xf32>
    %12 = arith.maximumf %10, %11 : vector<16x128xf32>
    %13 = vector.extract_strided_slice %4 {offsets = [0, 0], sizes = [16, 128], strides = [1, 1]} : vector<16x256xf32> to vector<16x128xf32>
    %14 = vector.extract_strided_slice %3 {offsets = [0, 128], sizes = [16, 128], strides = [1, 1]} : vector<16x256xf32> to vector<16x128xf32>
    %15 = arith.addf %13, %14 : vector<16x128xf32>
    %16 = vector.broadcast %5 : vector<1x128xf32> to vector<16x128xf32>
    %17 = arith.addf %15, %16 : vector<16x128xf32>
    %cst_9 = arith.constant 0.000000e+00 : f32
    %18 = vector.broadcast %cst_9 : f32 to vector<16x128xf32>
    %19 = arith.maximumf %17, %18 : vector<16x128xf32>
    %20 = arith.addf %12, %19 : vector<16x128xf32>
    %c0_10 = arith.constant 0 : index
    %c0_11 = arith.constant 0 : index
    %21 = vector.load %arg5[%c0_10, %c0_11] : memref<128x128xf32, #tpu.memory_space<vmem>>, vector<128x128xf32>
    %cst_12 = arith.constant dense<0.000000e+00> : vector<16x128xf32>
    %22 = tpu.matmul %20, %21, %cst_12 {dimension_numbers = #tpu.dot_dimension_numbers<[1], [0], [0], [1], [0, 0, 1, 1], [], []>} : vector<16x128xf32>, vector<128x128xf32>, vector<16x128xf32> -> vector<16x128xf32>
    %c0_13 = arith.constant 0 : index
    %c0_14 = arith.constant 0 : index
    %23 = vector.load %arg6[%c0_13, %c0_14] : memref<1x128xf32, #tpu.memory_space<vmem>>, vector<1x128xf32>
    %24 = vector.broadcast %23 : vector<1x128xf32> to vector<16x128xf32>
    %25 = arith.addf %22, %24 : vector<16x128xf32>
    %c0_15 = arith.constant 0 : index
    %c0_16 = arith.constant 0 : index
    %26 = vector.load %arg7[%c0_15, %c0_16] : memref<16x128xf32, #tpu.memory_space<vmem>>, vector<16x128xf32>
    tpu.vector_store %arg7[%c0_15, %c0_16], %25 {strides = array<i32>} : memref<16x128xf32, #tpu.memory_space<vmem>>, vector<16x128xf32>,
    return
  }
  func.func @transform_0(%arg0: i32) -> (i32, i32) {
    %c0_i32 = arith.constant 0 : i32
    %c0_i32_0 = arith.constant 0 : i32
    return %arg0, %c0_i32 : i32, i32
  }
  func.func @transform_1(%arg0: i32) -> (i32, i32) {
    %c0_i32 = arith.constant 0 : i32
    %c0_i32_0 = arith.constant 0 : i32
    return %arg0, %c0_i32 : i32, i32
  }
  func.func @transform_2(%arg0: i32) -> (i32, i32) {
    %c0_i32 = arith.constant 0 : i32
    %c0_i32_0 = arith.constant 0 : i32
    %c0_i32_1 = arith.constant 0 : i32
    return %c0_i32, %c0_i32_0 : i32, i32
  }
  func.func @transform_3(%arg0: i32) -> (i32, i32) {
    %c0_i32 = arith.constant 0 : i32
    %c0_i32_0 = arith.constant 0 : i32
    %c0_i32_1 = arith.constant 0 : i32
    return %c0_i32, %c0_i32_0 : i32, i32
  }
  func.func @transform_4(%arg0: i32) -> (i32, i32) {
    %c0_i32 = arith.constant 0 : i32
    %c0_i32_0 = arith.constant 0 : i32
    %c0_i32_1 = arith.constant 0 : i32
    return %c0_i32, %c0_i32_0 : i32, i32
  }
  func.func @transform_5(%arg0: i32) -> (i32, i32) {
    %c0_i32 = arith.constant 0 : i32
    %c0_i32_0 = arith.constant 0 : i32
    %c0_i32_1 = arith.constant 0 : i32
    return %c0_i32, %c0_i32_0 : i32, i32
  }
  func.func @transform_6(%arg0: i32) -> (i32, i32) {
    %c0_i32 = arith.constant 0 : i32
    %c0_i32_0 = arith.constant 0 : i32
    return %arg0, %c0_i32 : i32, i32
  }
}

</mosaic_0001>

<bundles_post_ra>
// kernel: tpu_custom_call.1
= control target key start
LH: loop header
LB: loop body
LE: loop exit
PB: predicated region body
PF: predicated region fallthrough
CT: control target
= control target key end

     0   :  { %11 = vsyncpa [#allocation3], 0  ;;  %s531_s0 = inlined_call_operand.hbm [shape: f32[16,128], index: 0, kind: input, shape index: {}]   ;;  %s532_s1 = inlined_call_operand.hbm [shape: f32[16,128], index: 1, kind: input, shape index: {}]   ;;  %s533_s2 = inlined_call_operand.hbm [shape: f32[128,256], index: 2, kind: input, shape index: {}]   ;;  %s534_s3 = inlined_call_operand.vmem [shape: f32[1,128], index: 3, kind: input, shape index: {}]   ;;  %s535_s4 = inlined_call_operand.hbm [shape: f32[128,128], index: 4, kind: input, shape index: {}]   ;;  %s536_s5 = inlined_call_operand.vmem [shape: f32[1,128], index: 5, kind: input, shape index: {}]   ;;  %s537_s6 = inlined_call_operand.hbm [shape: f32[16,128], index: 6, kind: output, shape index: {}]  }
   0x1   :  { %12 = vsyncpa [#allocation6], 0 }
   0x2   :  { %13 = vsyncpa [#allocation9], 0 }
   0x3   :  { %14 = vsyncpa [#allocation4], 0  ;;  %s32_s23 = sshll.u32 %s532_s1, 4  ;;  %s454_s24 = smov [#allocation5]   ;;  %s33_s23 = int_to_ptr.hbm [resolvable:$true] %s32_s23 }
   0x4   :  { %s34_s25 = sshll.u32 %s454_s24, 4  ;;  %s19_s28 = sshll.u32 %s531_s0, 4  ;;  %s35_s25 = int_to_ptr.vmem [resolvable:$true] %s34_s25  ;;  %s20_s28 = int_to_ptr.hbm [resolvable:$true] %s19_s28 }
   0x5   :  { %s455_s29 = smov 128   ;;  %s456_s30 = smov 8  }
   0x6   :  { %40 = dma.hbm_to_vmem [thread:$0]  %s33_s23, 256, %s35_s25, [#allocation6], %s455_s29, %s455_s29, %s456_s30  }
   0x7   :  { %s457_s7 = smov [#allocation2]   ;;  %s45_s1 = sshll.u32 %s533_s2, 4  ;;  %s46_s1 = int_to_ptr.hbm [resolvable:$true] %s45_s1 }
   0x8   :  { %s21_s8 = sshll.u32 %s457_s7, 4  ;;  %s458_s0 = smov [#allocation7]   ;;  %s22_s8 = int_to_ptr.vmem [resolvable:$true] %s21_s8 }
   0x9   :  { %27 = dma.hbm_to_vmem [thread:$0]  %s20_s28, 256, %s22_s8, [#allocation3], %s455_s29, %s455_s29, %s456_s30  }
   0xa   :  { %s47_s11 = sshll.u32 %s458_s0, 4  ;;  %s60_s14 = sshll.u32 %s535_s4, 4  ;;  %s48_s11 = int_to_ptr.vmem [resolvable:$true] %s47_s11  ;;  %s61_s14 = int_to_ptr.hbm [resolvable:$true] %s60_s14 }
   0xb   :  { %s459_s15 = smov 256   ;;  %s460_s16 = smov 16  }
   0xc   :  { %53 = dma.hbm_to_vmem [thread:$0]  %s46_s1, 4096, %s48_s11, [#allocation6], %s459_s15, %s459_s15, %s460_s16  }
   0xd   :  { %s461_s17 = smov [#allocation8]  }
   0xe   :  { %s62_s18 = sshll.u32 %s461_s17, 4  ;;  %s63_s18 = int_to_ptr.vmem [resolvable:$true] %s62_s18 }
   0xf   :  { %68 = dma.hbm_to_vmem [thread:$0]  %s61_s14, 2048, %s63_s18, [#allocation9], %s455_s29, %s455_s29, %s456_s30  }
  0x10   :  { %446 = dma.done.wait [#allocation3], 256  }
  0x11   :  { %447 = vsyncadd [#allocation3], 4294967040 }
  0x12   :  { %448 = dma.done.wait [#allocation6], 4352  }
  0x13   :  { %449 = vsyncadd [#allocation6], 4294962944 }
  0x14   :  { %450 = dma.done.wait [#allocation9], 2048  }
  0x15   :  { %451 = vsyncadd [#allocation9], 4294965248  ;;  %v121_v0 = vld [vmem:[#allocation7 + $0xf0] sm:$0xff]  ;;  %v122_v1 = vld [vmem:[#allocation7 + $0xf8] sm:$0xff]  ;;  %s462_s20 = smov [#allocation10]   ;;  %s284_s24 = sshll.u32 %s537_s6, 4  ;;  %s285_s24 = int_to_ptr.hbm [resolvable:$true] %s284_s24 }
  0x16   :  { %v119_v2 = vld [vmem:[#allocation7 + $0xe0] sm:$0xff]  ;;  %169 = vmatpush.msra.mxu2 %v121_v0  ;;  %192 = vmatpush.msra.mxu3 %v122_v1  ;;  %v120_v3 = vld [vmem:[#allocation7 + $0xe8] sm:$0xff]  ;;  %v117_v4 = vld [vmem:[#allocation7 + $0xd0] sm:$0xff]  ;;  %s282_s21 = sshll.u32 %s462_s20, 4  ;;  %s283_s21 = int_to_ptr.vmem [resolvable:$true] %s282_s21 }
  0x17   :  { %v118_v5 = vld [vmem:[#allocation7 + $0xd8] sm:$0xff]  ;;  %123 = vmatpush.msra.mxu0 %v121_v0  ;;  %146 = vmatpush.msra.mxu1 %v122_v1  ;;  %v115_v6 = vld [vmem:[#allocation7 + $0xc0] sm:$0xff]  ;;  %v116_v7 = vld [vmem:[#allocation7 + $0xc8] sm:$0xff] }
  0x18   :  { %170 = vmatpush.msra.mxu2 %v119_v2  ;;  %193 = vmatpush.msra.mxu3 %v120_v3  ;;  %v113_v8 = vld [vmem:[#allocation7 + $0xb0] sm:$0xff]  ;;  %v114_v9 = vld [vmem:[#allocation7 + $0xb8] sm:$0xff]  ;;  %v111_v10 = vld [vmem:[#allocation7 + $0xa0] sm:$0xff] }
  0x19   :  { %124 = vmatpush.msra.mxu0 %v119_v2  ;;  %147 = vmatpush.msra.mxu1 %v120_v3  ;;  %v112_v11 = vld [vmem:[#allocation7 + $0xa8] sm:$0xff]  ;;  %v109_v12 = vld [vmem:[#allocation7 + $0x90] sm:$0xff]  ;;  %v110_v13 = vld [vmem:[#allocation7 + $0x98] sm:$0xff] }
  0x1a   :  { %171 = vmatpush.msra.mxu2 %v117_v4  ;;  %194 = vmatpush.msra.mxu3 %v118_v5  ;;  %v107_v14 = vld [vmem:[#allocation7 + $0x80] sm:$0xff]  ;;  %v108_v15 = vld [vmem:[#allocation7 + $0x88] sm:$0xff]  ;;  %v105_v16 = vld [vmem:[#allocation7 + $0x70] sm:$0xff] }
  0x1b   :  { %125 = vmatpush.msra.mxu0 %v117_v4  ;;  %148 = vmatpush.msra.mxu1 %v118_v5  ;;  %v106_v17 = vld [vmem:[#allocation7 + $0x78] sm:$0xff]  ;;  %v103_v18 = vld [vmem:[#allocation7 + $0x60] sm:$0xff]  ;;  %v104_v19 = vld [vmem:[#allocation7 + $0x68] sm:$0xff] }
  0x1c   :  { %172 = vmatpush.msra.mxu2 %v115_v6  ;;  %195 = vmatpush.msra.mxu3 %v116_v7  ;;  %v101_v20 = vld [vmem:[#allocation7 + $0x50] sm:$0xff]  ;;  %v102_v21 = vld [vmem:[#allocation7 + $0x58] sm:$0xff]  ;;  %v99_v22 = vld [vmem:[#allocation7 + $0x40] sm:$0xff] }
  0x1d   :  { %126 = vmatpush.msra.mxu0 %v115_v6  ;;  %149 = vmatpush.msra.mxu1 %v116_v7  ;;  %v100_v23 = vld [vmem:[#allocation7 + $0x48] sm:$0xff]  ;;  %v97_v24 = vld [vmem:[#allocation7 + $0x30] sm:$0xff]  ;;  %v98_v25 = vld [vmem:[#allocation7 + $0x38] sm:$0xff] }
  0x1e   :  { %173 = vmatpush.msra.mxu2 %v113_v8  ;;  %196 = vmatpush.msra.mxu3 %v114_v9  ;;  %v95_v26 = vld [vmem:[#allocation7 + $0x20] sm:$0xff]  ;;  %v96_v27 = vld [vmem:[#allocation7 + $0x28] sm:$0xff]  ;;  %v93_v28 = vld [vmem:[#allocation7 + $0x10] sm:$0xff] }
  0x1f   :  { %127 = vmatpush.msra.mxu0 %v113_v8  ;;  %150 = vmatpush.msra.mxu1 %v114_v9  ;;  %v94_v29 = vld [vmem:[#allocation7 + $0x18] sm:$0xff]  ;;  %v91_v30 = vld [vmem:[#allocation7] sm:$0xff]  ;;  %v92_v31 = vld [vmem:[#allocation7 + $0x8] sm:$0xff] }
  0x20   :  { %174 = vmatpush.msra.mxu2 %v111_v10  ;;  %197 = vmatpush.msra.mxu3 %v112_v11  ;;  %v89_v32 = vld [vmem:[#allocation5] sm:$0xff]  ;;  %v87_v33 = vld [vmem:[#allocation2] sm:$0xff]  ;;  %v248_v34 = vld [vmem:[#allocation8 + $0x78] sm:$0xff] }
  0x21   :  { %128 = vmatpush.msra.mxu0 %v111_v10  ;;  %151 = vmatpush.msra.mxu1 %v112_v11  ;;  %v247_v35 = vld [vmem:[#allocation8 + $0x70] sm:$0xff]  ;;  %v246_v36 = vld [vmem:[#allocation8 + $0x68] sm:$0xff]  ;;  %v90_v37 = vld [vmem:[#allocation5 + $0x8] sm:$0xff] }
  0x22   :  { %175 = vmatpush.msra.mxu2 %v109_v12  ;;  %198 = vmatpush.msra.mxu3 %v110_v13  ;;  %v245_v38 = vld [vmem:[#allocation8 + $0x60] sm:$0xff]  ;;  %v88_v39 = vld [vmem:[#allocation2 + $0x8] sm:$0xff]  ;;  %v244_v40 = vld [vmem:[#allocation8 + $0x58] sm:$0xff] }
  0x23   :  { %129 = vmatpush.msra.mxu0 %v109_v12  ;;  %152 = vmatpush.msra.mxu1 %v110_v13  ;;  %v243_v41 = vld [vmem:[#allocation8 + $0x50] sm:$0xff]  ;;  %v242_v42 = vld [vmem:[#allocation8 + $0x48] sm:$0xff]  ;;  %v241_v43 = vld [vmem:[#allocation8 + $0x40] sm:$0xff] }
  0x24   :  { %176 = vmatpush.msra.mxu2 %v107_v14  ;;  %199 = vmatpush.msra.mxu3 %v108_v15  ;;  %v240_v44 = vld [vmem:[#allocation8 + $0x38] sm:$0xff]  ;;  %v239_v45 = vld [vmem:[#allocation8 + $0x30] sm:$0xff]  ;;  %v238_v46 = vld [vmem:[#allocation8 + $0x28] sm:$0xff] }
  0x25   :  { %130 = vmatpush.msra.mxu0 %v107_v14  ;;  %153 = vmatpush.msra.mxu1 %v108_v15  ;;  %v237_v47 = vld [vmem:[#allocation8 + $0x20] sm:$0xff]  ;;  %v236_v48 = vld [vmem:[#allocation8 + $0x18] sm:$0xff]  ;;  %v235_v49 = vld [vmem:[#allocation8 + $0x10] sm:$0xff] }
  0x26   :  { %177 = vmatpush.msra.mxu2 %v105_v16  ;;  %200 = vmatpush.msra.mxu3 %v106_v17  ;;  %v234_v50 = vld [vmem:[#allocation8 + $0x8] sm:$0xff]  ;;  %v233_v51 = vld [vmem:[#allocation8] sm:$0xff] }
  0x27   :  { %131 = vmatpush.msra.mxu0 %v105_v16  ;;  %154 = vmatpush.msra.mxu1 %v106_v17  ;;  %v324_v54 = vld [vmem:[%s534_s3] ss:$0 sm:$0xff] }
  0x28   :  { %178 = vmatpush.msra.mxu2 %v103_v18  ;;  %201 = vmatpush.msra.mxu3 %v104_v19  ;;  %v325_v11 = vld [vmem:[%s536_s5] ss:$0 sm:$0xff] }
  0x29   :  { %132 = vmatpush.msra.mxu0 %v103_v18  ;;  %155 = vmatpush.msra.mxu1 %v104_v19 }
  0x2a   :  { %179 = vmatpush.msra.mxu2 %v101_v20  ;;  %202 = vmatpush.msra.mxu3 %v102_v21 }
  0x2b   :  { %133 = vmatpush.msra.mxu0 %v101_v20  ;;  %156 = vmatpush.msra.mxu1 %v102_v21 }
  0x2c   :  { %180 = vmatpush.msra.mxu2 %v99_v22  ;;  %203 = vmatpush.msra.mxu3 %v100_v23 }
  0x2d   :  { %134 = vmatpush.msra.mxu0 %v99_v22  ;;  %157 = vmatpush.msra.mxu1 %v100_v23 }
  0x2e   :  { %181 = vmatpush.msra.mxu2 %v97_v24  ;;  %204 = vmatpush.msra.mxu3 %v98_v25 }
  0x2f   :  { %135 = vmatpush.msra.mxu0 %v97_v24  ;;  %158 = vmatpush.msra.mxu1 %v98_v25 }
  0x30   :  { %182 = vmatpush.msra.mxu2 %v95_v26  ;;  %205 = vmatpush.msra.mxu3 %v96_v27 }
  0x31   :  { %136 = vmatpush.msra.mxu0 %v95_v26  ;;  %159 = vmatpush.msra.mxu1 %v96_v27 }
  0x32   :  { %183 = vmatpush.msra.mxu2 %v93_v28  ;;  %206 = vmatpush.msra.mxu3 %v94_v29 }
  0x33   :  { %137 = vmatpush.msra.mxu0 %v93_v28  ;;  %160 = vmatpush.msra.mxu1 %v94_v29 }
  0x34   :  { %184 = vmatpush.msra.mxu2 %v91_v30  ;;  %207 = vmatpush.msra.mxu3 %v92_v31 }
  0x35   :  { %185 = vmatmul.f32.vlgmr.msra.gmra.mxu2 %v89_v32  ;;  %208 = vmatmul.f32.vlgmr.msra.gmra.mxu3 %v89_v32 }
  0x36   :  { %138 = vmatpush.msra.mxu0 %v91_v30  ;;  %161 = vmatpush.msra.mxu1 %v92_v31 }
  0x37   :  { %139 = vmatmul.f32.vlgmr.msra.gmra.mxu0 %v87_v33  ;;  %162 = vmatmul.f32.vlgmr.msra.gmra.mxu1 %v87_v33 }
  0x38   :  { %253 = vmatpush.msrb.mxu0 %v248_v34  ;;  %299 = vmatpush.msrb.mxu1 %v248_v34 }
  0x3a   :  { %254 = vmatpush.msrb.mxu0 %v247_v35  ;;  %300 = vmatpush.msrb.mxu1 %v247_v35 }
  0x3c   :  { %255 = vmatpush.msrb.mxu0 %v246_v36  ;;  %301 = vmatpush.msrb.mxu1 %v246_v36 }
  0x3d   :  { %188 = vmatmul.f32.gmra.mxu2 %v90_v37  ;;  %211 = vmatmul.f32.gmra.mxu3 %v90_v37 }
  0x3e   :  { %256 = vmatpush.msrb.mxu0 %v245_v38  ;;  %302 = vmatpush.msrb.mxu1 %v245_v38 }
  0x3f   :  { %142 = vmatmul.f32.gmra.mxu0 %v88_v39  ;;  %165 = vmatmul.f32.gmra.mxu1 %v88_v39 }
  0x40   :  { %257 = vmatpush.msrb.mxu0 %v244_v40  ;;  %303 = vmatpush.msrb.mxu1 %v244_v40 }
  0x42   :  { %258 = vmatpush.msrb.mxu0 %v243_v41  ;;  %304 = vmatpush.msrb.mxu1 %v243_v41 }
  0x44   :  { %259 = vmatpush.msrb.mxu0 %v242_v42  ;;  %305 = vmatpush.msrb.mxu1 %v242_v42 }
  0x46   :  { %260 = vmatpush.msrb.mxu0 %v241_v43  ;;  %306 = vmatpush.msrb.mxu1 %v241_v43 }
  0x48   :  { %261 = vmatpush.msrb.mxu0 %v240_v44  ;;  %307 = vmatpush.msrb.mxu1 %v240_v44 }
  0x4a   :  { %262 = vmatpush.msrb.mxu0 %v239_v45  ;;  %308 = vmatpush.msrb.mxu1 %v239_v45 }
  0x4c   :  { %263 = vmatpush.msrb.mxu0 %v238_v46  ;;  %309 = vmatpush.msrb.mxu1 %v238_v46 }
  0x4e   :  { %264 = vmatpush.msrb.mxu0 %v237_v47  ;;  %310 = vmatpush.msrb.mxu1 %v237_v47 }
  0x50   :  { %265 = vmatpush.msrb.mxu0 %v236_v48  ;;  %311 = vmatpush.msrb.mxu1 %v236_v48 }
  0x52   :  { %266 = vmatpush.msrb.mxu0 %v235_v49  ;;  %312 = vmatpush.msrb.mxu1 %v235_v49 }
  0x54   :  { %267 = vmatpush.msrb.mxu0 %v234_v50  ;;  %313 = vmatpush.msrb.mxu1 %v234_v50 }
  0x56   :  { %268 = vmatpush.msrb.mxu0 %v233_v51  ;;  %314 = vmatpush.msrb.mxu1 %v233_v51 }
  0xb4   :  { %v140_v52 = vpop.f32.mrf.mxu0  ;;  %v163_v53 = vpop.f32.mrf.mxu1 }
  0xb8   :  { %v186_v55 = vpop.f32.mrf.mxu2  ;;  %v209_v56 = vpop.f32.mrf.mxu3 }
  0xb9   :  { %v225_v57 = vadd.f32 %v186_v55, %v163_v53  ;;  %v216_v58 = vadd.f32 %v209_v56, %v140_v52 }
  0xbb   :  { %v227_v59 = vadd.f32 %v324_v54, %v225_v57  ;;  %v221_v60 = vadd.f32 %v324_v54, %v216_v58 }
  0xbc   :  { %v143_v63 = vpop.f32.mrf.mxu0  ;;  %v166_v0 = vpop.f32.mrf.mxu1 }
  0xbd   :  { %v229_v61 = vmax.f32 %v227_v59, 0.0  ;;  %v223_v62 = vmax.f32 %v221_v60, 0.0 }
  0xbf   :  { %v231_v1 = vadd.f32 %v229_v61, %v223_v62 }
  0xc0   :  { %v189_v2 = vpop.f32.mrf.mxu2  ;;  %v212_v3 = vpop.f32.mrf.mxu3 }
  0xc1   :  { %v226_v4 = vadd.f32 %v189_v2, %v166_v0  ;;  %v217_v5 = vadd.f32 %v212_v3, %v143_v63  ;;  %269 = vmatmul.f32.vlgmr.msrb.gmra.mxu0 %v231_v1 }
  0xc3   :  { %v228_v6 = vadd.f32 %v324_v54, %v226_v4  ;;  %v222_v7 = vadd.f32 %v324_v54, %v217_v5 }
  0xc5   :  { %v230_v8 = vmax.f32 %v228_v6, 0.0  ;;  %v224_v9 = vmax.f32 %v222_v7, 0.0 }
  0xc7   :  { %v232_v10 = vadd.f32 %v230_v8, %v224_v9 }
  0xc9   :  { %272 = vmatmul.f32.vlgmr.msrb.gmra.mxu1 %v232_v10 }
 0x13e   :  { %v270_v12 = vpop.f32.mrf.mxu0 }
 0x13f   :  { %v271_v13 = vadd.f32 %v325_v11, %v270_v12 }
 0x141   :  { %276 = vst [vmem:[#allocation10] sm:$0xff] %v271_v13 }
 0x146   :  { %v273_v14 = vpop.f32.mrf.mxu1 }
 0x147   :  { %v274_v15 = vadd.f32 %v325_v11, %v273_v14 }
 0x149   :  { %277 = vst [vmem:[#allocation10 + $0x8] sm:$0xff] %v274_v15 }
 0x14a   :  { %290 = dma.vmem_to_hbm [thread:$0]  %s283_s21, 256, %s285_s24, [#allocation4], %s455_s29, %s455_s29, %s456_s30  }
 0x14b   :  { %452 = dma.done.wait [#allocation4], 256  }
 0x14c   :  { %453 = vsyncadd [#allocation4], 4294967040 }
 0x14d   :  { %295 = vsyncpa [#allocation3], 1 }
 0x14e   :  { %296 = vsyncpa [#allocation6], 1 }
 0x14f   :  { %297 = vsyncpa [#allocation9], 1 }
 0x150   :  { %298 = vsyncpa [#allocation4], 1 }

</bundles_post_ra>
